<compile_context>
chip_gen: v5e
topology: v5e:2x2
jax: 0.10.0
libtpu: 0.0.40
codegen_flags: <defaults>
</compile_context>

<pallas_src>
import functools

import jax
import jax.numpy as jnp
from jax.experimental import pallas as pl
from jax.experimental.pallas import tpu as pltpu


def _round_up(n: int, m: int) -> int:
    return ((n + m - 1) // m) * m


def _classifier_kernel(*refs, apply_dropout: bool):
    if apply_dropout:
        x_ref, w1_ref, b1_ref, w2_ref, b2_ref, mask_ref, out_ref = refs
    else:
        x_ref, w1_ref, b1_ref, w2_ref, b2_ref, out_ref = refs
        mask_ref = None

    # ---- fc1 (bf16 operands, f32 MXU accumulation) + bias + ReLU -----------
    h = jnp.dot(x_ref[...], w1_ref[...], preferred_element_type=jnp.float32)
    h = jnp.maximum(h + b1_ref[...], 0.0)                       # [TB, Hp] f32

    # ---- Dropout: pre-scaled keep mask (0 or 1/(1-p)) ----------------------
    if apply_dropout:
        h = h * mask_ref[...].astype(jnp.float32)

    # ---- fc2 + bias (padded classes carry -1e30 bias -> exp() == 0) -------
    logits = jnp.dot(h, w2_ref[...], preferred_element_type=jnp.float32)
    logits = logits + b2_ref[...]                               # [TB, Op] f32

    # ---- log_softmax over the (lane-dense, padded) class dim --------------
    m = jnp.max(logits, axis=-1, keepdims=True)
    z = logits - m
    lse = jnp.log(jnp.sum(jnp.exp(z), axis=-1, keepdims=True))
    out_ref[...] = z - lse


def classifier_forward(x, w1, b1, w2, b2, *, drop_p=0.2, training=False,
                       rng=None, block_b=256):
    """x: [B, C, H, W] (NCHW) or flat [B, D].  w1: [D, H], w2: [H, O] (already
    transposed to `in x out`).  Returns log-probs [B, O] (float32)."""
    B = x.shape[0]
    x2 = x.reshape(B, -1)
    D = x2.shape[1]
    Din, H = w1.shape
    Hin, O = w2.shape
    assert D == Din and H == Hin

    # Padded, TPU-friendly shapes.
    Dp = _round_up(D, 128)
    Hp = _round_up(H, 128)
    Op = _round_up(O, 128)
    TB = min(int(block_b), _round_up(B, 8))   # batch tile (sublane-aligned)
    Bp = _round_up(B, TB)

    # Zero padding of D/H is numerically inert (zero contributions); padded
    # class biases use -1e30 so log_softmax over the padded lanes is exact.
    x_p = jnp.zeros((Bp, Dp), jnp.bfloat16).at[:B, :D].set(x2.astype(jnp.bfloat16))
    w1_p = jnp.zeros((Dp, Hp), jnp.bfloat16).at[:D, :H].set(w1.astype(jnp.bfloat16))
    b1_p = jnp.zeros((1, Hp), jnp.float32).at[:, :H].set(
        b1.reshape(1, -1).astype(jnp.float32))
    w2_p = jnp.zeros((Hp, Op), jnp.float32).at[:H, :O].set(w2.astype(jnp.float32))
    b2_p = jnp.full((1, Op), -1e30, jnp.float32).at[:, :O].set(
        b2.reshape(1, -1).astype(jnp.float32))

    apply_dropout = bool(training) and float(drop_p) > 0.0

    inputs = [x_p, w1_p, b1_p, w2_p, b2_p]
    in_specs = [
        pl.BlockSpec((TB, Dp), lambda i: (i, 0)),   # x tile marches over batch
        pl.BlockSpec((Dp, Hp), lambda i: (0, 0)),   # w1 resident
        pl.BlockSpec((1, Hp), lambda i: (0, 0)),    # b1 resident
        pl.BlockSpec((Hp, Op), lambda i: (0, 0)),   # w2 resident
        pl.BlockSpec((1, Op), lambda i: (0, 0)),    # b2 resident
    ]

    if apply_dropout:
        if rng is None:
            rng = jax.random.PRNGKey(0)
        keep = jax.random.bernoulli(rng, 1.0 - float(drop_p), (Bp, Hp))
        scale = jnp.bfloat16(1.0 / (1.0 - float(drop_p)))
        mask = keep.astype(jnp.bfloat16) * scale                 # 0 or 1/(1-p)
        inputs.append(mask)
        in_specs.append(pl.BlockSpec((TB, Hp), lambda i: (i, 0)))

    kernel = functools.partial(_classifier_kernel, apply_dropout=apply_dropout)

    out_p = pl.pallas_call(
        kernel,
        out_shape=jax.ShapeDtypeStruct((Bp, Op), jnp.float32),
        grid=(Bp // TB,),
        in_specs=in_specs,
        out_specs=pl.BlockSpec((TB, Op), lambda i: (i, 0)),
        compiler_params=pltpu.CompilerParams(
            dimension_semantics=("parallel",)),
    )(*inputs)

    return out_p[:B, :O]


def _reference_forward(x, w1, b1, w2, b2):
    """Pure-JAX eval-mode reference (dropout = identity), same bf16 fc1 path."""
    B = x.shape[0]
    x2 = x.reshape(B, -1)
    h = jnp.dot(x2.astype(jnp.bfloat16), w1.astype(jnp.bfloat16),
                preferred_element_type=jnp.float32)
    h = jnp.maximum(h + b1.reshape(1, -1).astype(jnp.float32), 0.0)
    logits = h @ w2.astype(jnp.float32) + b2.reshape(1, -1).astype(jnp.float32)
    return jax.nn.log_softmax(logits, axis=1)


if __name__ == "__main__":
    # Shapes implied by the module: input_size = C*H*W, hidden_layer, output_size.
    B, C, Himg, Wimg = 2, 4, 16, 16
    input_size = C * Himg * Wimg        # 1024
    hidden_layer = 32
    output_size = 10
    drop_p = 0.2

    key = jax.random.PRNGKey(0)
    kx, k1, kb1, k2, kb2, kdrop = jax.random.split(key, 6)

    x = jax.random.normal(kx, (B, C, Himg, Wimg), dtype=jnp.float32)

    # PyTorch nn.Linear-style init, stored as [in, out] for x @ W matmuls.
    bound1 = 1.0 / (input_size ** 0.5)
    w1 = jax.random.uniform(k1, (input_size, hidden_layer), jnp.float32,
                            -bound1, bound1)
    b1 = jax.random.uniform(kb1, (1, hidden_layer), jnp.float32, -bound1, bound1)

    bound2 = 1.0 / (hidden_layer ** 0.5)
    w2 = jax.random.uniform(k2, (hidden_layer, output_size), jnp.float32,
                            -bound2, bound2)
    b2 = jax.random.uniform(kb2, (1, output_size), jnp.float32, -bound2, bound2)

    # Eval-mode run (dropout = identity) — deterministic, checked vs. pure JAX.
    out = classifier_forward(x, w1, b1, w2, b2, drop_p=drop_p, training=False)
    out = jax.block_until_ready(out)

    ref = _reference_forward(x, w1, b1, w2, b2)
    assert out.shape == (B, output_size)
    assert jnp.allclose(out, ref, atol=2e-3, rtol=2e-3), "mismatch vs. JAX reference"

    # Training-mode run exercises the dropout path (host-side mask; PyTorch's
    # exact RNG stream is not reproducible, only the distribution).
    out_train = classifier_forward(x, w1, b1, w2, b2, drop_p=drop_p,
                                   training=True, rng=kdrop)
    out_train = jax.block_until_ready(out_train)
    assert out_train.shape == (B, output_size)
    assert bool(jnp.all(jnp.isfinite(out_train)))

    print("KERNEL_OK")
</pallas_src>

<mosaic_0001>
module attributes {stable_mosaic.version = 11 : i64} {
  func.func @_classifier_kernel(%arg0: i32, %arg1: memref<8x1024xbf16, #tpu.memory_space<vmem>>, %arg2: memref<1024x128xbf16, #tpu.memory_space<vmem>>, %arg3: memref<1x128xf32, #tpu.memory_space<vmem>>, %arg4: memref<128x128xf32, #tpu.memory_space<vmem>>, %arg5: memref<1x128xf32, #tpu.memory_space<vmem>>, %arg6: memref<8x128xf32, #tpu.memory_space<vmem>>) attributes {dimension_semantics = [#tpu.dimension_semantics<parallel>], iteration_bounds = array<i64: 1>, scalar_prefetch = 0 : i64, scratch_operands = 0 : i64, tpu.core_type = #tpu.core_type<tc>, window_params = [{transform_indices = @transform_0, window_bounds = array<i64: 8, 1024>}, {pipeline_mode = #tpu.pipeline_mode<synchronous>, transform_indices = @transform_1, window_bounds = array<i64: 1024, 128>}, {pipeline_mode = #tpu.pipeline_mode<synchronous>, transform_indices = @transform_2, window_bounds = array<i64: 1, 128>}, {pipeline_mode = #tpu.pipeline_mode<synchronous>, transform_indices = @transform_3, window_bounds = array<i64: 128, 128>}, {pipeline_mode = #tpu.pipeline_mode<synchronous>, transform_indices = @transform_4, window_bounds = array<i64: 1, 128>}, {transform_indices = @transform_5, window_bounds = array<i64: 8, 128>}]} {
    %c0 = arith.constant 0 : index
    %c0_0 = arith.constant 0 : index
    %0 = vector.load %arg1[%c0, %c0_0] : memref<8x1024xbf16, #tpu.memory_space<vmem>>, vector<8x1024xbf16>
    %c0_1 = arith.constant 0 : index
    %c0_2 = arith.constant 0 : index
    %1 = vector.load %arg2[%c0_1, %c0_2] : memref<1024x128xbf16, #tpu.memory_space<vmem>>, vector<1024x128xbf16>
    %cst = arith.constant dense<0.000000e+00> : vector<8x128xf32>
    %2 = tpu.matmul %0, %1, %cst {dimension_numbers = #tpu.dot_dimension_numbers<[1], [0], [0], [1], [0, 0, 1, 1], [], []>} : vector<8x1024xbf16>, vector<1024x128xbf16>, vector<8x128xf32> -> vector<8x128xf32>
    %c0_3 = arith.constant 0 : index
    %c0_4 = arith.constant 0 : index
    %3 = vector.load %arg3[%c0_3, %c0_4] : memref<1x128xf32, #tpu.memory_space<vmem>>, vector<1x128xf32>
    %4 = vector.broadcast %3 : vector<1x128xf32> to vector<8x128xf32>
    %5 = arith.addf %2, %4 : vector<8x128xf32>
    %cst_5 = arith.constant 0.000000e+00 : f32
    %6 = vector.broadcast %cst_5 : f32 to vector<8x128xf32>
    %7 = arith.maximumf %5, %6 : vector<8x128xf32>
    %c0_6 = arith.constant 0 : index
    %c0_7 = arith.constant 0 : index
    %8 = vector.load %arg4[%c0_6, %c0_7] : memref<128x128xf32, #tpu.memory_space<vmem>>, vector<128x128xf32>
    %cst_8 = arith.constant dense<0.000000e+00> : vector<8x128xf32>
    %9 = tpu.matmul %7, %8, %cst_8 {dimension_numbers = #tpu.dot_dimension_numbers<[1], [0], [0], [1], [0, 0, 1, 1], [], []>} : vector<8x128xf32>, vector<128x128xf32>, vector<8x128xf32> -> vector<8x128xf32>
    %c0_9 = arith.constant 0 : index
    %c0_10 = arith.constant 0 : index
    %10 = vector.load %arg5[%c0_9, %c0_10] : memref<1x128xf32, #tpu.memory_space<vmem>>, vector<1x128xf32>
    %11 = vector.broadcast %10 : vector<1x128xf32> to vector<8x128xf32>
    %12 = arith.addf %9, %11 : vector<8x128xf32>
    %cst_11 = arith.constant dense<0xFF800000> : vector<8xf32>
    %13 = vector.multi_reduction <maximumf>, %12, %cst_11 [1] : vector<8x128xf32> to vector<8xf32>
    %14 = vector.shape_cast %13 : vector<8xf32> to vector<8x1xf32>
    %15 = vector.broadcast %14 : vector<8x1xf32> to vector<8x128xf32>
    %16 = arith.subf %12, %15 : vector<8x128xf32>
    %17 = math.exp %16 : vector<8x128xf32>
    %cst_12 = arith.constant dense<0.000000e+00> : vector<8xf32>
    %18 = vector.multi_reduction <add>, %17, %cst_12 [1] : vector<8x128xf32> to vector<8xf32>
    %19 = vector.shape_cast %18 : vector<8xf32> to vector<8x1xf32>
    %20 = math.log %19 : vector<8x1xf32>
    %21 = vector.broadcast %20 : vector<8x1xf32> to vector<8x128xf32>
    %22 = arith.subf %16, %21 : vector<8x128xf32>
    %c0_13 = arith.constant 0 : index
    %c0_14 = arith.constant 0 : index
    %23 = vector.load %arg6[%c0_13, %c0_14] : memref<8x128xf32, #tpu.memory_space<vmem>>, vector<8x128xf32>
    tpu.vector_store %arg6[%c0_13, %c0_14], %22 {strides = array<i32>} : memref<8x128xf32, #tpu.memory_space<vmem>>, vector<8x128xf32>,
    return
  }
  func.func @transform_0(%arg0: i32) -> (i32, i32) {
    %c0_i32 = arith.constant 0 : i32
    %c0_i32_0 = arith.constant 0 : i32
    return %arg0, %c0_i32 : i32, i32
  }
  func.func @transform_1(%arg0: i32) -> (i32, i32) {
    %c0_i32 = arith.constant 0 : i32
    %c0_i32_0 = arith.constant 0 : i32
    %c0_i32_1 = arith.constant 0 : i32
    return %c0_i32, %c0_i32_0 : i32, i32
  }
  func.func @transform_2(%arg0: i32) -> (i32, i32) {
    %c0_i32 = arith.constant 0 : i32
    %c0_i32_0 = arith.constant 0 : i32
    %c0_i32_1 = arith.constant 0 : i32
    return %c0_i32, %c0_i32_0 : i32, i32
  }
  func.func @transform_3(%arg0: i32) -> (i32, i32) {
    %c0_i32 = arith.constant 0 : i32
    %c0_i32_0 = arith.constant 0 : i32
    %c0_i32_1 = arith.constant 0 : i32
    return %c0_i32, %c0_i32_0 : i32, i32
  }
  func.func @transform_4(%arg0: i32) -> (i32, i32) {
    %c0_i32 = arith.constant 0 : i32
    %c0_i32_0 = arith.constant 0 : i32
    %c0_i32_1 = arith.constant 0 : i32
    return %c0_i32, %c0_i32_0 : i32, i32
  }
  func.func @transform_5(%arg0: i32) -> (i32, i32) {
    %c0_i32 = arith.constant 0 : i32
    %c0_i32_0 = arith.constant 0 : i32
    return %arg0, %c0_i32 : i32, i32
  }
}

</mosaic_0001>

<bundles_post_ra>
// kernel: tpu_custom_call.1
= control target key start
LH: loop header
LB: loop body
LE: loop exit
PB: predicated region body
PF: predicated region fallthrough
CT: control target
= control target key end

     0   :  { %10 = vsyncpa [#allocation3], 0  ;;  %s1280_s0 = inlined_call_operand.hbm [shape: bf16[8,1024], index: 0, kind: input, shape index: {}]   ;;  %s1281_s1 = inlined_call_operand.hbm [shape: bf16[1024,128], index: 1, kind: input, shape index: {}]   ;;  %s1282_s2 = inlined_call_operand.vmem [shape: f32[1,128], index: 2, kind: input, shape index: {}]   ;;  %s1283_s3 = inlined_call_operand.hbm [shape: f32[128,128], index: 3, kind: input, shape index: {}]   ;;  %s1284_s4 = inlined_call_operand.vmem [shape: f32[1,128], index: 4, kind: input, shape index: {}]   ;;  %s1285_s5 = inlined_call_operand.hbm [shape: f32[8,128], index: 5, kind: output, shape index: {}]  }
   0x1   :  { %11 = vsyncpa [#allocation6], 0  ;;  %s28_s20 = sshll.u32 %s1281_s1, 4  ;;  %s29_s20 = int_to_ptr.hbm [resolvable:$true] %s28_s20 }
   0x2   :  { %12 = vsyncpa [#allocation4], 0  ;;  %s1224_s21 = smov [#allocation5]   ;;  %s18_s25 = sshll.u32 %s1280_s0, 4  ;;  %s19_s25 = int_to_ptr.hbm [resolvable:$true] %s18_s25 }
   0x3   :  { %s30_s22 = sshll.u32 %s1224_s21, 4  ;;  %s1225_s26 = smov 64   ;;  %s31_s22 = int_to_ptr.vmem [resolvable:$true] %s30_s22 }
   0x4   :  { %s1226_s27 = smov 4   ;;  %s1227_s28 = smov [#allocation2]  }
   0x5   :  { %36 = dma.hbm_to_vmem [thread:$0]  %s29_s20, 8192, %s31_s22, [#allocation6], %s1225_s26, %s1225_s26, %s1226_s27  }
   0x6   :  { %s20_s29 = sshll.u32 %s1227_s28, 4  ;;  %s43_s7 = sshll.u32 %s1283_s3, 4  ;;  %s21_s29 = int_to_ptr.vmem [resolvable:$true] %s20_s29  ;;  %s44_s7 = int_to_ptr.hbm [resolvable:$true] %s43_s7 }
   0x7   :  { %23 = dma.hbm_to_vmem [thread:$0]  %s19_s25, 512, %s21_s29, [#allocation3]  }
   0x8   :  { %s1228_s1 = smov [#allocation7]   ;;  %s1229_s9 = smov 128  }
   0x9   :  { %s45_s8 = sshll.u32 %s1228_s1, 4  ;;  %s1230_s10 = smov 8   ;;  %s46_s8 = int_to_ptr.vmem [resolvable:$true] %s45_s8 }
   0xa   :  { %51 = dma.hbm_to_vmem [thread:$0]  %s44_s7, 2048, %s46_s8, [#allocation6], %s1229_s9, %s1229_s9, %s1230_s10  }
   0xb   :  { %1218 = dma.done.wait [#allocation3], 512  }
   0xc   :  { %1219 = vsyncadd [#allocation3], 4294966784 }
   0xd   :  { %1220 = dma.done.wait [#allocation6], 10240  }
   0xe   :  { %1221 = vsyncadd [#allocation6], 4294957056  ;;  %v1051_v0 = vld [vmem:[#allocation5 + $0x38] sm:$0xff]  ;;  %v1050_v4 = vld [vmem:[#allocation5 + $0x30] sm:$0xff]  ;;  %s1231_s12 = smov [#allocation8]   ;;  %s777_s16 = sshll.u32 %s1285_s5, 4  ;;  %s778_s16 = int_to_ptr.hbm [resolvable:$true] %s777_s16 }
   0xf   :  { %v1059_v1 = vld [vmem:[#allocation5 + $0x78] sm:$0xff]  ;;  %614 = vmatpush.bf16.msra.mxu0 %v1051_v0  ;;  %v1058_v5 = vld [vmem:[#allocation5 + $0x70] sm:$0xff]  ;;  %v1049_v8 = vld [vmem:[#allocation5 + $0x28] sm:$0xff]  ;;  %s775_s13 = sshll.u32 %s1231_s12, 4  ;;  %s776_s13 = int_to_ptr.vmem [resolvable:$true] %s775_s13 }
  0x10   :  { %v1067_v2 = vld [vmem:[#allocation5 + $0xb8] sm:$0xff]  ;;  %627 = vmatpush.bf16.msra.mxu1 %v1059_v1  ;;  %v1066_v6 = vld [vmem:[#allocation5 + $0xb0] sm:$0xff]  ;;  %v1057_v9 = vld [vmem:[#allocation5 + $0x68] sm:$0xff] }
  0x11   :  { %v1075_v3 = vld [vmem:[#allocation5 + $0xf8] sm:$0xff]  ;;  %640 = vmatpush.bf16.msra.mxu2 %v1067_v2  ;;  %v1074_v7 = vld [vmem:[#allocation5 + $0xf0] sm:$0xff]  ;;  %v1065_v10 = vld [vmem:[#allocation5 + $0xa8] sm:$0xff] }
  0x12   :  { %653 = vmatpush.bf16.msra.mxu3 %v1075_v3  ;;  %v1073_v11 = vld [vmem:[#allocation5 + $0xe8] sm:$0xff]  ;;  %v1048_v12 = vld [vmem:[#allocation5 + $0x20] sm:$0xff]  ;;  %v1047_v16 = vld [vmem:[#allocation5 + $0x18] sm:$0xff] }
  0x13   :  { %615 = vmatpush.bf16.msra.mxu0 %v1050_v4  ;;  %v1056_v13 = vld [vmem:[#allocation5 + $0x60] sm:$0xff]  ;;  %v1055_v17 = vld [vmem:[#allocation5 + $0x58] sm:$0xff]  ;;  %v1046_v20 = vld [vmem:[#allocation5 + $0x10] sm:$0xff] }
  0x14   :  { %628 = vmatpush.bf16.msra.mxu1 %v1058_v5  ;;  %v1064_v14 = vld [vmem:[#allocation5 + $0xa0] sm:$0xff]  ;;  %v1063_v18 = vld [vmem:[#allocation5 + $0x98] sm:$0xff]  ;;  %v1054_v21 = vld [vmem:[#allocation5 + $0x50] sm:$0xff] }
  0x15   :  { %641 = vmatpush.bf16.msra.mxu2 %v1066_v6  ;;  %v1072_v15 = vld [vmem:[#allocation5 + $0xe0] sm:$0xff]  ;;  %v1071_v19 = vld [vmem:[#allocation5 + $0xd8] sm:$0xff]  ;;  %v1062_v22 = vld [vmem:[#allocation5 + $0x90] sm:$0xff] }
  0x16   :  { %654 = vmatpush.bf16.msra.mxu3 %v1074_v7  ;;  %v1070_v23 = vld [vmem:[#allocation5 + $0xd0] sm:$0xff]  ;;  %v1045_v24 = vld [vmem:[#allocation5 + $0x8] sm:$0xff]  ;;  %v66_v29 = vld [vmem:[#allocation2] sm:$0xff] }
  0x17   :  { %616 = vmatpush.bf16.msra.mxu0 %v1049_v8  ;;  %v1053_v25 = vld [vmem:[#allocation5 + $0x48] sm:$0xff]  ;;  %v1044_v30 = vld [vmem:[#allocation5] sm:$0xff]  ;;  %v206_v33 = vunpack.c.l.b16 %v66_v29  ;;  %v207_v37 = vunpack.c.h.b16 %v66_v29  ;;  %v1083_v38 = vld [vmem:[#allocation5 + $0x138] sm:$0xff] }
  0x18   :  { %629 = vmatpush.bf16.msra.mxu1 %v1057_v9  ;;  %v1061_v26 = vld [vmem:[#allocation5 + $0x88] sm:$0xff]  ;;  %v1052_v31 = vld [vmem:[#allocation5 + $0x40] sm:$0xff]  ;;  %v1091_v39 = vld [vmem:[#allocation5 + $0x178] sm:$0xff] }
  0x19   :  { %642 = vmatpush.bf16.msra.mxu2 %v1065_v10  ;;  %v1069_v27 = vld [vmem:[#allocation5 + $0xc8] sm:$0xff]  ;;  %v1060_v34 = vld [vmem:[#allocation5 + $0x80] sm:$0xff]  ;;  %v1099_v40 = vld [vmem:[#allocation5 + $0x1b8] sm:$0xff]  ;;  %v214_v43 = vpack.c.b16 %v206_v33, %v206_v33  ;;  %v215_v45 = vpack.c.b16 %v207_v37, %v207_v37 }
  0x1a   :  { %655 = vmatpush.bf16.msra.mxu3 %v1073_v11  ;;  %v67_v28 = vld [vmem:[#allocation2 + $0x8] sm:$0xff]  ;;  %v1068_v35 = vld [vmem:[#allocation5 + $0xc0] sm:$0xff]  ;;  %v1107_v41 = vld [vmem:[#allocation5 + $0x1f8] sm:$0xff] }
  0x1b   :  { %617 = vmatpush.bf16.msra.mxu0 %v1048_v12  ;;  %v208_v32 = vunpack.c.l.b16 %v67_v28  ;;  %v209_v36 = vunpack.c.h.b16 %v67_v28  ;;  %v1082_v46 = vld [vmem:[#allocation5 + $0x130] sm:$0xff]  ;;  %v1081_v50 = vld [vmem:[#allocation5 + $0x128] sm:$0xff]  ;;  %v1080_v54 = vld [vmem:[#allocation5 + $0x120] sm:$0xff] }
  0x1c   :  { %630 = vmatpush.bf16.msra.mxu1 %v1056_v13  ;;  %v1090_v47 = vld [vmem:[#allocation5 + $0x170] sm:$0xff]  ;;  %v1089_v51 = vld [vmem:[#allocation5 + $0x168] sm:$0xff]  ;;  %v1088_v55 = vld [vmem:[#allocation5 + $0x160] sm:$0xff] }
  0x1d   :  { %643 = vmatpush.bf16.msra.mxu2 %v1064_v14  ;;  %v216_v42 = vpack.c.b16 %v208_v32, %v208_v32  ;;  %v217_v44 = vpack.c.b16 %v209_v36, %v209_v36  ;;  %v1098_v48 = vld [vmem:[#allocation5 + $0x1b0] sm:$0xff]  ;;  %v1097_v52 = vld [vmem:[#allocation5 + $0x1a8] sm:$0xff]  ;;  %v1096_v56 = vld [vmem:[#allocation5 + $0x1a0] sm:$0xff] }
  0x1e   :  { %656 = vmatpush.bf16.msra.mxu3 %v1072_v15  ;;  %v1106_v49 = vld [vmem:[#allocation5 + $0x1f0] sm:$0xff]  ;;  %v1105_v53 = vld [vmem:[#allocation5 + $0x1e8] sm:$0xff]  ;;  %v1104_v57 = vld [vmem:[#allocation5 + $0x1e0] sm:$0xff] }
  0x1f   :  { %618 = vmatpush.bf16.msra.mxu0 %v1047_v16  ;;  %v1079_v58 = vld [vmem:[#allocation5 + $0x118] sm:$0xff]  ;;  %v1078_v62 = vld [vmem:[#allocation5 + $0x110] sm:$0xff]  ;;  %v1077_v2 = vld [vmem:[#allocation5 + $0x108] sm:$0xff] }
  0x20   :  { %631 = vmatpush.bf16.msra.mxu1 %v1055_v17  ;;  %v1087_v59 = vld [vmem:[#allocation5 + $0x158] sm:$0xff]  ;;  %v1086_v63 = vld [vmem:[#allocation5 + $0x150] sm:$0xff]  ;;  %v1085_v3 = vld [vmem:[#allocation5 + $0x148] sm:$0xff] }
  0x21   :  { %644 = vmatpush.bf16.msra.mxu2 %v1063_v18  ;;  %v1095_v60 = vld [vmem:[#allocation5 + $0x198] sm:$0xff]  ;;  %v1094_v0 = vld [vmem:[#allocation5 + $0x190] sm:$0xff]  ;;  %v1093_v5 = vld [vmem:[#allocation5 + $0x188] sm:$0xff] }
  0x22   :  { %657 = vmatpush.bf16.msra.mxu3 %v1071_v19  ;;  %v1103_v61 = vld [vmem:[#allocation5 + $0x1d8] sm:$0xff]  ;;  %v1102_v1 = vld [vmem:[#allocation5 + $0x1d0] sm:$0xff]  ;;  %v1101_v6 = vld [vmem:[#allocation5 + $0x1c8] sm:$0xff] }
  0x23   :  { %619 = vmatpush.bf16.msra.mxu0 %v1046_v20  ;;  %v68_v4 = vld [vmem:[#allocation2 + $0x10] sm:$0xff]  ;;  %v69_v7 = vld [vmem:[#allocation2 + $0x18] sm:$0xff]  ;;  %v1076_v10 = vld [vmem:[#allocation5 + $0x100] sm:$0xff] }
  0x24   :  { %632 = vmatpush.bf16.msra.mxu1 %v1054_v21  ;;  %v210_v8 = vunpack.c.l.b16 %v68_v4  ;;  %v211_v9 = vunpack.c.h.b16 %v68_v4  ;;  %v1084_v11 = vld [vmem:[#allocation5 + $0x140] sm:$0xff]  ;;  %v212_v12 = vunpack.c.l.b16 %v69_v7  ;;  %v213_v13 = vunpack.c.h.b16 %v69_v7  ;;  %v734_v20 = vld [vmem:[#allocation7 + $0x78] sm:$0xff]  ;;  %v733_v21 = vld [vmem:[#allocation7 + $0x70] sm:$0xff] }
  0x25   :  { %645 = vmatpush.bf16.msra.mxu2 %v1062_v22  ;;  %v1092_v14 = vld [vmem:[#allocation5 + $0x180] sm:$0xff]  ;;  %v732_v22 = vld [vmem:[#allocation7 + $0x68] sm:$0xff]  ;;  %v726_v28 = vld [vmem:[#allocation7 + $0x38] sm:$0xff] }
  0x26   :  { %658 = vmatpush.bf16.msra.mxu3 %v1070_v23  ;;  %v1100_v15 = vld [vmem:[#allocation5 + $0x1c0] sm:$0xff]  ;;  %v218_v16 = vpack.c.b16 %v210_v8, %v210_v8  ;;  %v219_v17 = vpack.c.b16 %v211_v9, %v211_v9  ;;  %v220_v18 = vpack.c.b16 %v212_v12, %v212_v12  ;;  %v221_v19 = vpack.c.b16 %v213_v13, %v213_v13  ;;  %v725_v29 = vld [vmem:[#allocation7 + $0x30] sm:$0xff] }
  0x27   :  { %620 = vmatpush.bf16.msra.mxu0 %v1045_v24  ;;  %v731_v23 = vld [vmem:[#allocation7 + $0x60] sm:$0xff]  ;;  %v730_v24 = vld [vmem:[#allocation7 + $0x58] sm:$0xff] }
  0x28   :  { %633 = vmatpush.bf16.msra.mxu1 %v1053_v25  ;;  %v729_v25 = vld [vmem:[#allocation7 + $0x50] sm:$0xff]  ;;  %v723_v32 = vld [vmem:[#allocation7 + $0x20] sm:$0xff] }
  0x29   :  { %646 = vmatpush.bf16.msra.mxu2 %v1061_v26  ;;  %v728_v26 = vld [vmem:[#allocation7 + $0x48] sm:$0xff] }
  0x2a   :  { %659 = vmatpush.bf16.msra.mxu3 %v1069_v27  ;;  %v727_v27 = vld [vmem:[#allocation7 + $0x40] sm:$0xff] }
  0x2b   :  { %621 = vmatpush.bf16.msra.mxu0 %v1044_v30  ;;  %v724_v30 = vld [vmem:[#allocation7 + $0x28] sm:$0xff] }
  0x2c   :  { %634 = vmatpush.bf16.msra.mxu1 %v1052_v31 }
  0x2d   :  { %647 = vmatpush.bf16.msra.mxu2 %v1060_v34  ;;  %v722_v34 = vld [vmem:[#allocation7 + $0x18] sm:$0xff] }
  0x2e   :  { %660 = vmatpush.bf16.msra.mxu3 %v1068_v35  ;;  %622 = vmatmul.bf16.vlgmr.msra.gmra.mxu0 %v214_v43  ;;  %v721_v35 = vld [vmem:[#allocation7 + $0x10] sm:$0xff] }
  0x2f   :  { %666 = vmatpush.bf16.msrb.mxu0 %v1083_v38  ;;  %635 = vmatmul.bf16.vlgmr.msra.gmra.mxu1 %v215_v45  ;;  %v720_v38 = vld [vmem:[#allocation7 + $0x8] sm:$0xff] }
  0x30   :  { %679 = vmatpush.bf16.msrb.mxu1 %v1091_v39  ;;  %648 = vmatmul.bf16.vlgmr.msra.gmra.mxu2 %v216_v42  ;;  %v1116_v42 = vld [vmem:[%s1282_s2] ss:$0 sm:$0xff] }
  0x31   :  { %692 = vmatpush.bf16.msrb.mxu2 %v1099_v40  ;;  %661 = vmatmul.bf16.vlgmr.msra.gmra.mxu3 %v217_v44 }
  0x32   :  { %705 = vmatpush.bf16.msrb.mxu3 %v1107_v41  ;;  %v719_v41 = vld [vmem:[#allocation7] sm:$0xff] }
  0x33   :  { %667 = vmatpush.bf16.msrb.mxu0 %v1082_v46 }
  0x34   :  { %680 = vmatpush.bf16.msrb.mxu1 %v1090_v47 }
  0x35   :  { %693 = vmatpush.bf16.msrb.mxu2 %v1098_v48 }
  0x36   :  { %706 = vmatpush.bf16.msrb.mxu3 %v1106_v49 }
  0x37   :  { %668 = vmatpush.bf16.msrb.mxu0 %v1081_v50 }
  0x38   :  { %681 = vmatpush.bf16.msrb.mxu1 %v1089_v51 }
  0x39   :  { %694 = vmatpush.bf16.msrb.mxu2 %v1097_v52 }
  0x3a   :  { %707 = vmatpush.bf16.msrb.mxu3 %v1105_v53 }
  0x3b   :  { %669 = vmatpush.bf16.msrb.mxu0 %v1080_v54 }
  0x3c   :  { %682 = vmatpush.bf16.msrb.mxu1 %v1088_v55 }
  0x3d   :  { %695 = vmatpush.bf16.msrb.mxu2 %v1096_v56 }
  0x3e   :  { %708 = vmatpush.bf16.msrb.mxu3 %v1104_v57 }
  0x3f   :  { %670 = vmatpush.bf16.msrb.mxu0 %v1079_v58 }
  0x40   :  { %683 = vmatpush.bf16.msrb.mxu1 %v1087_v59 }
  0x41   :  { %696 = vmatpush.bf16.msrb.mxu2 %v1095_v60 }
  0x42   :  { %709 = vmatpush.bf16.msrb.mxu3 %v1103_v61 }
  0x43   :  { %671 = vmatpush.bf16.msrb.mxu0 %v1078_v62  ;;  %v1117_v62 = vld [vmem:[%s1284_s4] ss:$0 sm:$0xff] }
  0x44   :  { %684 = vmatpush.bf16.msrb.mxu1 %v1086_v63 }
  0x45   :  { %697 = vmatpush.bf16.msrb.mxu2 %v1094_v0 }
  0x46   :  { %710 = vmatpush.bf16.msrb.mxu3 %v1102_v1 }
  0x47   :  { %672 = vmatpush.bf16.msrb.mxu0 %v1077_v2 }
  0x48   :  { %685 = vmatpush.bf16.msrb.mxu1 %v1085_v3 }
  0x49   :  { %698 = vmatpush.bf16.msrb.mxu2 %v1093_v5 }
  0x4a   :  { %711 = vmatpush.bf16.msrb.mxu3 %v1101_v6 }
  0x4b   :  { %673 = vmatpush.bf16.msrb.mxu0 %v1076_v10 }
  0x4c   :  { %686 = vmatpush.bf16.msrb.mxu1 %v1084_v11 }
  0x4d   :  { %699 = vmatpush.bf16.msrb.mxu2 %v1092_v14 }
  0x4e   :  { %712 = vmatpush.bf16.msrb.mxu3 %v1100_v15  ;;  %674 = vmatmul.bf16.vlgmr.msrb.gmra.mxu0 %v218_v16 }
  0x4f   :  { %687 = vmatmul.bf16.vlgmr.msrb.gmra.mxu1 %v219_v17  ;;  %739 = vmatpush.msra.mxu0 %v734_v20 }
  0x50   :  { %700 = vmatmul.bf16.vlgmr.msrb.gmra.mxu2 %v220_v18 }
  0x51   :  { %713 = vmatmul.bf16.vlgmr.msrb.gmra.mxu3 %v221_v19  ;;  %740 = vmatpush.msra.mxu0 %v733_v21 }
  0x53   :  { %741 = vmatpush.msra.mxu0 %v732_v22 }
  0x55   :  { %742 = vmatpush.msra.mxu0 %v731_v23 }
  0x57   :  { %743 = vmatpush.msra.mxu0 %v730_v24 }
  0x59   :  { %744 = vmatpush.msra.mxu0 %v729_v25 }
  0x5b   :  { %745 = vmatpush.msra.mxu0 %v728_v26 }
  0x5d   :  { %746 = vmatpush.msra.mxu0 %v727_v27 }
  0x5f   :  { %747 = vmatpush.msra.mxu0 %v726_v28 }
  0x61   :  { %748 = vmatpush.msra.mxu0 %v725_v29 }
  0x63   :  { %749 = vmatpush.msra.mxu0 %v724_v30 }
  0x65   :  { %750 = vmatpush.msra.mxu0 %v723_v32 }
  0x67   :  { %751 = vmatpush.msra.mxu0 %v722_v34 }
  0x69   :  { %752 = vmatpush.msra.mxu0 %v721_v35 }
  0x6b   :  { %753 = vmatpush.msra.mxu0 %v720_v38 }
  0x6d   :  { %754 = vmatpush.msra.mxu0 %v719_v41 }
  0xab   :  { %v623_v31 = vpop.f32.mrf.mxu0 }
  0xac   :  { %v636_v33 = vpop.f32.mrf.mxu1  ;;  %v624_v45 = vadd.f32 %v1116_v42, %v623_v31 }
  0xae   :  { %v637_v46 = vadd.f32 %v636_v33, %v624_v45 }
  0xb3   :  { %v649_v36 = vpop.f32.mrf.mxu2  ;;  %v625_v39 = vpop.f32.mrf.mxu0 }
  0xb4   :  { %v662_v37 = vpop.f32.mrf.mxu3  ;;  %v638_v40 = vpop.f32.mrf.mxu1  ;;  %v650_v47 = vadd.f32 %v649_v36, %v637_v46 }
  0xb6   :  { %v663_v48 = vadd.f32 %v662_v37, %v650_v47 }
  0xbb   :  { %v651_v43 = vpop.f32.mrf.mxu2 }
  0xbc   :  { %v664_v44 = vpop.f32.mrf.mxu3 }
  0xcb   :  { %v675_v49 = vpop.f32.mrf.mxu0 }
  0xcc   :  { %v688_v50 = vpop.f32.mrf.mxu1  ;;  %v676_v51 = vadd.f32 %v675_v49, %v663_v48 }
  0xce   :  { %v689_v52 = vadd.f32 %v688_v50, %v676_v51 }
  0xd3   :  { %v701_v53 = vpop.f32.mrf.mxu2  ;;  %v677_v56 = vpop.f32.mrf.mxu0 }
  0xd4   :  { %v714_v54 = vpop.f32.mrf.mxu3  ;;  %v702_v55 = vadd.f32 %v701_v53, %v689_v52  ;;  %v690_v57 = vpop.f32.mrf.mxu1 }
  0xd6   :  { %v715_v58 = vadd.f32 %v714_v54, %v702_v55 }
  0xd8   :  { %v718_v59 = vmax.f32 %v715_v58, 0.0 }
  0xda   :  { %755 = vmatmul.f32.vlgmr.msra.gmra.mxu0 %v718_v59 }
  0xdb   :  { %v703_v60 = vpop.f32.mrf.mxu2 }
  0xdc   :  { %v716_v61 = vpop.f32.mrf.mxu3 }
 0x157   :  { %v756_v63 = vpop.f32.mrf.mxu0 }
 0x158   :  { %v757_v0 = vadd.f32 %v1117_v62, %v756_v63 }
 0x15a   :  { %759 = vmax.xlane.f32.xlu0 %v757_v0 }
 0x1cd   :  { %v760_v1 = vpop.xlane.xlu0 %759 }
 0x1ce   :  { %v761_v2 = vsub.f32 %v757_v0, %v760_v1 }
 0x1d0   :  { %v762_v3 = vmul.f32 1.442695, %v761_v2 }
 0x1d2   :  { %1118 = vpow2.f32 %v762_v3 }
 0x1d8   :  { %v1119_v4 = vpop.eup %1118 }
 0x1d9   :  { %764 = vadd.xlane.f32.xlu0 %v1119_v4 }
 0x24c   :  { %v765_v5 = vpop.xlane.xlu0 %764 }
 0x24d   :  { %1120 = vlog2.f32 %v765_v5 }
 0x253   :  { %v1121_v6 = vpop.eup %1120 }
 0x254   :  { %v767_v7 = vmul.f32 0.6931472, %v1121_v6 }
 0x256   :  { %v768_v8 = vsub.f32 %v761_v2, %v767_v7 }
 0x258   :  { %769 = vst [vmem:[#allocation8] sm:$0xff] %v768_v8 }
 0x259   :  { %780 = dma.vmem_to_hbm [thread:$0]  %s776_s13, 128, %s778_s16, [#allocation4]  }
 0x25a   :  { %1222 = dma.done.wait [#allocation4], 128  }
 0x25b   :  { %1223 = vsyncadd [#allocation4], 4294967168 }
 0x25c   :  { %785 = vsyncpa [#allocation3], 1 }
 0x25d   :  { %786 = vsyncpa [#allocation6], 1 }
 0x25e   :  { %787 = vsyncpa [#allocation4], 1 }

</bundles_post_ra>
